<compile_context>
chip_gen: v7x
topology: tpu7x:2x2x1
jax: 0.10.0
libtpu: 0.0.40
codegen_flags: <defaults>
</compile_context>

<pallas_src>
import functools

import jax
import jax.numpy as jnp
from jax.experimental import pallas as pl
from jax.experimental.pallas import tpu as pltpu


# ----------------------------------------------------------------------------
# Small helpers
# ----------------------------------------------------------------------------
def _round_up(x, m):
    return ((x + m - 1) // m) * m


def _vmem_capacity_bytes():
    try:
        return int(pltpu.get_tpu_info().vmem_capacity_bytes)
    except Exception:
        return 64 << 20  # conservative (v7x-sized) fallback


def _vmem_tile_bytes(shape, itemsize):
    """Bytes of one VMEM-resident array including (8,128) tile padding."""
    if len(shape) == 1:
        rows, cols = 1, shape[0]
    else:
        rows, cols = shape[-2], shape[-1]
    lead = 1
    for d in shape[:-2]:
        lead *= int(d)
    return lead * _round_up(int(rows), 8) * _round_up(int(cols), 128) * itemsize


def _pad_params(params, h_pad, matmul_dtype):
    """Zero-pad hidden dims to h_pad; weights stored in matmul dtype."""
    padded = []
    for li, (w, ba) in enumerate(params):
        fin, fout = w.shape
        fin_pad = fin if li == 0 else h_pad  # layer-0 input dim = F (unpadded)
        w_p = jnp.zeros((fin_pad, h_pad), matmul_dtype)
        w_p = w_p.at[:fin, :fout].set(w.astype(matmul_dtype))
        ba_p = jnp.zeros((2, h_pad), jnp.float32)
        ba_p = ba_p.at[:, :fout].set(ba.astype(jnp.float32))
        padded.append((w_p, ba_p))
    return padded


# ----------------------------------------------------------------------------
# Fused path: all layers in one grid-less kernel (graph fits in VMEM)
# ----------------------------------------------------------------------------
def _fused_gcn_kernel(n_layers, cdt, a_ref, x_ref, *refs):
    # refs = (w_0, ba_0, ..., w_{L-1}, ba_{L-1}, o_ref)
    o_ref = refs[-1]
    a = a_ref[...]                      # matmul dtype (bf16)
    h = x_ref[...]                      # f32
    for li in range(n_layers):
        w = refs[2 * li][...]           # matmul dtype
        ba = refs[2 * li + 1][...]      # f32
        xw = jnp.dot(h.astype(cdt), w, preferred_element_type=jnp.float32)
        h = jnp.dot(a, xw.astype(cdt), preferred_element_type=jnp.float32)
        h = h + ba[0:1, :]
        if li != n_layers - 1:
            h = jnp.where(h > 0.0, h, ba[1:2, :] * h)   # per-channel PReLU
    o_ref[...] = h.astype(o_ref.dtype)


def gcn_forward_fused(a_cast, feat, padded_params, h_pad, matmul_dtype, vmem_limit):
    n = feat.shape[0]
    flat = []
    for w, ba in padded_params:
        flat += [w, ba]
    kernel = functools.partial(_fused_gcn_kernel, len(padded_params), matmul_dtype)
    return pl.pallas_call(
        kernel,
        out_shape=jax.ShapeDtypeStruct((n, h_pad), jnp.float32),
        compiler_params=pltpu.CompilerParams(vmem_limit_bytes=int(vmem_limit)),
    )(a_cast, feat, *flat)


# ----------------------------------------------------------------------------
# Tiled path: per layer,
#   phase 1: XW = X @ W           (tiny K=F -> one XLA dot, per perf review)
#   phase 2: act(A @ XW + b)      (Pallas, M x K tiled, fp32 accumulator)
# ----------------------------------------------------------------------------
def _make_agg_kernel(apply_prelu):
    def kernel(a_ref, xw_ref, ba_ref, o_ref, acc_ref):
        k = pl.program_id(1)

        @pl.when(k == 0)
        def _():
            acc_ref[...] = jnp.zeros_like(acc_ref)

        acc_ref[...] += jnp.dot(
            a_ref[...], xw_ref[...], preferred_element_type=jnp.float32
        )

        @pl.when(k == pl.num_programs(1) - 1)
        def _():
            h = acc_ref[...] + ba_ref[0:1, :]
            if apply_prelu:
                h = jnp.where(h > 0.0, h, ba_ref[1:2, :] * h)
            o_ref[...] = h.astype(o_ref.dtype)

    return kernel


def gcn_layer_agg_tiled(a_pad, xw, ba, *, apply_prelu, tile_m, tile_k, h_pad,
                        vmem_limit):
    n_pad = a_pad.shape[0]
    grid = (n_pad // tile_m, n_pad // tile_k)
    itemsize_a = jnp.dtype(a_pad.dtype).itemsize
    itemsize_x = jnp.dtype(xw.dtype).itemsize
    cost = pl.CostEstimate(
        flops=int(2 * n_pad * n_pad * h_pad),
        transcendentals=0,
        bytes_accessed=int(
            n_pad * n_pad * itemsize_a                 # A
            + grid[0] * n_pad * h_pad * itemsize_x     # XW (re-read per row tile)
            + 2 * h_pad * 4                            # bias/alpha
            + n_pad * h_pad * 4                        # output
        ),
    )
    return pl.pallas_call(
        _make_agg_kernel(apply_prelu),
        out_shape=jax.ShapeDtypeStruct((n_pad, h_pad), jnp.float32),
        grid_spec=pltpu.PrefetchScalarGridSpec(
            num_scalar_prefetch=0,
            grid=grid,
            in_specs=[
                pl.BlockSpec((tile_m, tile_k), lambda i, k: (i, k)),  # A tile
                pl.BlockSpec((tile_k, h_pad), lambda i, k: (k, 0)),   # XW K-tile
                pl.BlockSpec((2, h_pad), lambda i, k: (0, 0)),        # bias+alpha
            ],
            out_specs=pl.BlockSpec((tile_m, h_pad), lambda i, k: (i, 0)),
            scratch_shapes=[pltpu.VMEM((tile_m, h_pad), jnp.float32)],
        ),
        compiler_params=pltpu.CompilerParams(
            dimension_semantics=("parallel", "arbitrary"),
            vmem_limit_bytes=int(vmem_limit),
        ),
        cost_estimate=cost,
    )(a_pad, xw, ba)


def gcn_forward_tiled(a_pad, feat_pad, padded_params, h_pad, matmul_dtype,
                      tile_m, tile_k, vmem_limit):
    n_layers = len(padded_params)
    h = feat_pad
    for li, (w, ba) in enumerate(padded_params):
        # Phase 1: feature transform.  K = F (or H) is small, so a single dense
        # XLA dot beats a pallas_call here (launch/DMA overhead dominated).
        xw = jnp.dot(h.astype(matmul_dtype), w,
                     preferred_element_type=jnp.float32).astype(matmul_dtype)
        # Phase 2: K-tiled aggregation + bias + PReLU in Pallas.
        h = gcn_layer_agg_tiled(
            a_pad, xw, ba,
            apply_prelu=(li != n_layers - 1),
            tile_m=tile_m, tile_k=tile_k, h_pad=h_pad, vmem_limit=vmem_limit,
        )
    return h


# ----------------------------------------------------------------------------
# Encoder wrapper
# ----------------------------------------------------------------------------
def gcn_encoder_forward(a_norm, feat, params, p_drop=0.0, corrupt=False, key=None,
                        mode="auto", matmul_dtype=jnp.bfloat16):
    """Forward pass of GCNEncoder.

    a_norm : (N, N) symmetrically normalized adjacency (float32)
    feat   : (N, F) node features (float32)
    params : list of (W, ba) per layer; ba = stack([bias, prelu_alpha]).
             Last layer has no activation.
    mode   : "auto" | "fused" | "tiled"
    """
    if corrupt:
        perm = jax.random.permutation(key, feat.shape[0])
        feat = feat[perm]

    feat = feat.astype(jnp.float32)
    n, f = feat.shape
    n_hidden = params[-1][0].shape[1]
    h_pad = _round_up(max(n_hidden, 128), 128)          # lane-dense hidden dim
    padded_params = _pad_params(params, h_pad, matmul_dtype)

    cap = _vmem_capacity_bytes()
    fused_budget = int(0.72 * cap)                      # generation-aware budget
    itemsize_mm = jnp.dtype(matmul_dtype).itemsize

    if mode == "auto":
        # Footprint estimate including (8,128) tile padding + temporaries.
        footprint = (
            _vmem_tile_bytes((n, n), itemsize_mm)       # A
            + _vmem_tile_bytes((n, f), 4)               # X
            + 4 * _vmem_tile_bytes((n, h_pad), 4)       # h / xw temporaries + out
            + sum(_vmem_tile_bytes(w.shape, itemsize_mm)
                  + _vmem_tile_bytes(ba.shape, 4) for w, ba in padded_params)
        )
        mode = "fused" if int(1.5 * footprint) <= fused_budget else "tiled"

    if mode == "fused":
        a_cast = a_norm.astype(matmul_dtype)
        out = gcn_forward_fused(a_cast, feat, padded_params, h_pad,
                                matmul_dtype, vmem_limit=fused_budget)
        out = out[:, :n_hidden]
    else:
        # tile size: 512 on 128-MiB-VMEM parts (v5e/v6e), 256 on v7x (64 MiB)
        tile = 512 if cap >= (100 << 20) else 256
        tile = min(tile, _round_up(n, 256))
        n_pad = _round_up(n, tile)
        a_pad = jnp.zeros((n_pad, n_pad), matmul_dtype)
        a_pad = a_pad.at[:n, :n].set(a_norm.astype(matmul_dtype))
        feat_pad = jnp.zeros((n_pad, f), jnp.float32).at[:n, :].set(feat)
        tiled_limit = min(64 << 20, fused_budget)
        out = gcn_forward_tiled(a_pad, feat_pad, padded_params, h_pad,
                                matmul_dtype, tile_m=tile, tile_k=tile,
                                vmem_limit=tiled_limit)
        out = out[:n, :n_hidden]

    # TODO(synk): nn.Dropout in training mode (random mask + 1/(1-p) rescale) is
    # omitted between layers; inference (eval) semantics are identity.
    return out


# ----------------------------------------------------------------------------
# Parameter init / graph construction / reference
# ----------------------------------------------------------------------------
def init_params(key, n_in_feats, n_hidden, n_layers):
    """Deterministic parameter init mirroring DGL GraphConv + nn.PReLU shapes."""
    params = []
    dims = [n_in_feats] + [n_hidden] * (n_layers - 1)
    for li in range(n_layers):
        key, wk = jax.random.split(key)
        fan_in, fan_out = dims[li], n_hidden
        limit = (6.0 / (fan_in + fan_out)) ** 0.5       # xavier_uniform (DGL default)
        w = jax.random.uniform(wk, (fan_in, fan_out), jnp.float32, -limit, limit)
        b = jnp.zeros((1, n_hidden), jnp.float32)
        alpha = jnp.full((1, n_hidden), 0.25, jnp.float32)  # nn.PReLU default
        ba = jnp.concatenate([b, alpha], axis=0)        # (2, H): row0=bias, row1=alpha
        params.append((w, ba))
    return params


def build_normalized_adjacency(key, n_nodes, edge_prob=0.2):
    """Random symmetric graph -> D^-1/2 A D^-1/2 (DGL GraphConv norm='both')."""
    upper = jax.random.bernoulli(key, edge_prob, (n_nodes, n_nodes)).astype(jnp.float32)
    upper = jnp.triu(upper, k=1)
    a = upper + upper.T
    deg = jnp.sum(a, axis=1)
    inv_sqrt = jnp.where(deg > 0, 1.0 / jnp.sqrt(jnp.maximum(deg, 1e-12)), 0.0)
    return a * inv_sqrt[:, None] * inv_sqrt[None, :]


def reference_forward(a_norm, feat, params):
    """Pure-JAX f32 reference."""
    n_layers = len(params)
    h = feat
    for li, (w, ba) in enumerate(params):
        h = a_norm @ (h @ w) + ba[0:1, :]
        if li != n_layers - 1:
            h = jnp.where(h > 0.0, h, ba[1:2, :] * h)
    return h


if __name__ == "__main__":
    key = jax.random.PRNGKey(0)
    k_graph, k_feat, k_params, k_graph2, k_feat2 = jax.random.split(key, 5)

    n_in_feats = 32
    n_hidden = 32
    n_layers = 3          # input layer + 1 hidden layer + output layer
    p_drop = 0.1
    params = init_params(k_params, n_in_feats, n_hidden, n_layers)

    # bf16 MXU operands with f32 accumulation -> loosened tolerance vs f32 ref.
    TOL = dict(atol=3e-2, rtol=3e-2)

    # --- small graph: fused single-kernel path (everything resident in VMEM) ---
    N = 64
    a_norm = build_normalized_adjacency(k_graph, N)
    feat = jax.random.normal(k_feat, (N, n_in_feats), jnp.float32)

    out = gcn_encoder_forward(a_norm, feat, params, p_drop=p_drop, mode="fused")
    out = jax.block_until_ready(out)
    assert out.shape == (N, n_hidden)
    assert out.dtype == jnp.float32
    ref = reference_forward(a_norm, feat, params)
    assert jnp.allclose(out, ref, **TOL)

    # --- larger graph: tiled path (K-tiled aggregation, fp32 accumulator) ---
    N2 = 256
    a2 = build_normalized_adjacency(k_graph2, N2)
    feat2 = jax.random.normal(k_feat2, (N2, n_in_feats), jnp.float32)

    out2 = gcn_encoder_forward(a2, feat2, params, p_drop=p_drop, mode="tiled")
    out2 = jax.block_until_ready(out2)
    assert out2.shape == (N2, n_hidden)
    ref2 = reference_forward(a2, feat2, params)
    assert jnp.allclose(out2, ref2, **TOL)

    print("KERNEL_OK")
</pallas_src>

<mosaic_0001>
module attributes {stable_mosaic.version = 11 : i64} {
  func.func @_fused_gcn_kernel(%arg0: memref<64x64xbf16, #tpu.memory_space<vmem>>, %arg1: memref<64x32xf32, #tpu.memory_space<vmem>>, %arg2: memref<32x128xbf16, #tpu.memory_space<vmem>>, %arg3: memref<2x128xf32, #tpu.memory_space<vmem>>, %arg4: memref<128x128xbf16, #tpu.memory_space<vmem>>, %arg5: memref<2x128xf32, #tpu.memory_space<vmem>>, %arg6: memref<128x128xbf16, #tpu.memory_space<vmem>>, %arg7: memref<2x128xf32, #tpu.memory_space<vmem>>, %arg8: memref<64x128xf32, #tpu.memory_space<vmem>>) attributes {dimension_semantics = [], scalar_prefetch = 0 : i64, scratch_operands = 0 : i64, tpu.core_type = #tpu.core_type<tc>} {
    %c0 = arith.constant 0 : index
    %c0_0 = arith.constant 0 : index
    %0 = vector.load %arg0[%c0, %c0_0] : memref<64x64xbf16, #tpu.memory_space<vmem>>, vector<64x64xbf16>
    %c0_1 = arith.constant 0 : index
    %c0_2 = arith.constant 0 : index
    %1 = vector.load %arg1[%c0_1, %c0_2] : memref<64x32xf32, #tpu.memory_space<vmem>>, vector<64x32xf32>
    %c0_3 = arith.constant 0 : index
    %c0_4 = arith.constant 0 : index
    %2 = vector.load %arg2[%c0_3, %c0_4] : memref<32x128xbf16, #tpu.memory_space<vmem>>, vector<32x128xbf16>
    %c0_5 = arith.constant 0 : index
    %c0_6 = arith.constant 0 : index
    %3 = vector.load %arg3[%c0_5, %c0_6] : memref<2x128xf32, #tpu.memory_space<vmem>>, vector<2x128xf32>
    %4 = arith.truncf %1 : vector<64x32xf32> to vector<64x32xbf16>
    %cst = arith.constant dense<0.000000e+00> : vector<64x128xf32>
    %5 = tpu.matmul %4, %2, %cst {dimension_numbers = #tpu.dot_dimension_numbers<[1], [0], [0], [1], [0, 0, 1, 1], [], []>} : vector<64x32xbf16>, vector<32x128xbf16>, vector<64x128xf32> -> vector<64x128xf32>
    %6 = arith.truncf %5 : vector<64x128xf32> to vector<64x128xbf16>
    %cst_7 = arith.constant dense<0.000000e+00> : vector<64x128xf32>
    %7 = tpu.matmul %0, %6, %cst_7 {dimension_numbers = #tpu.dot_dimension_numbers<[1], [0], [0], [1], [0, 0, 1, 1], [], []>} : vector<64x64xbf16>, vector<64x128xbf16>, vector<64x128xf32> -> vector<64x128xf32>
    %8 = vector.extract_strided_slice %3 {offsets = [0, 0], sizes = [1, 128], strides = [1, 1]} : vector<2x128xf32> to vector<1x128xf32>
    %9 = vector.broadcast %8 : vector<1x128xf32> to vector<64x128xf32>
    %10 = arith.addf %7, %9 : vector<64x128xf32>
    %cst_8 = arith.constant 0.000000e+00 : f32
    %11 = vector.broadcast %cst_8 : f32 to vector<64x128xf32>
    %12 = arith.cmpf ogt, %10, %11 : vector<64x128xf32>
    %13 = vector.extract_strided_slice %3 {offsets = [1, 0], sizes = [1, 128], strides = [1, 1]} : vector<2x128xf32> to vector<1x128xf32>
    %14 = vector.broadcast %13 : vector<1x128xf32> to vector<64x128xf32>
    %15 = arith.mulf %14, %10 : vector<64x128xf32>
    %16 = arith.select %12, %10, %15 : vector<64x128xi1>, vector<64x128xf32>
    %c0_9 = arith.constant 0 : index
    %c0_10 = arith.constant 0 : index
    %17 = vector.load %arg4[%c0_9, %c0_10] : memref<128x128xbf16, #tpu.memory_space<vmem>>, vector<128x128xbf16>
    %c0_11 = arith.constant 0 : index
    %c0_12 = arith.constant 0 : index
    %18 = vector.load %arg5[%c0_11, %c0_12] : memref<2x128xf32, #tpu.memory_space<vmem>>, vector<2x128xf32>
    %19 = arith.truncf %16 : vector<64x128xf32> to vector<64x128xbf16>
    %cst_13 = arith.constant dense<0.000000e+00> : vector<64x128xf32>
    %20 = tpu.matmul %19, %17, %cst_13 {dimension_numbers = #tpu.dot_dimension_numbers<[1], [0], [0], [1], [0, 0, 1, 1], [], []>} : vector<64x128xbf16>, vector<128x128xbf16>, vector<64x128xf32> -> vector<64x128xf32>
    %21 = arith.truncf %20 : vector<64x128xf32> to vector<64x128xbf16>
    %cst_14 = arith.constant dense<0.000000e+00> : vector<64x128xf32>
    %22 = tpu.matmul %0, %21, %cst_14 {dimension_numbers = #tpu.dot_dimension_numbers<[1], [0], [0], [1], [0, 0, 1, 1], [], []>} : vector<64x64xbf16>, vector<64x128xbf16>, vector<64x128xf32> -> vector<64x128xf32>
    %23 = vector.extract_strided_slice %18 {offsets = [0, 0], sizes = [1, 128], strides = [1, 1]} : vector<2x128xf32> to vector<1x128xf32>
    %24 = vector.broadcast %23 : vector<1x128xf32> to vector<64x128xf32>
    %25 = arith.addf %22, %24 : vector<64x128xf32>
    %cst_15 = arith.constant 0.000000e+00 : f32
    %26 = vector.broadcast %cst_15 : f32 to vector<64x128xf32>
    %27 = arith.cmpf ogt, %25, %26 : vector<64x128xf32>
    %28 = vector.extract_strided_slice %18 {offsets = [1, 0], sizes = [1, 128], strides = [1, 1]} : vector<2x128xf32> to vector<1x128xf32>
    %29 = vector.broadcast %28 : vector<1x128xf32> to vector<64x128xf32>
    %30 = arith.mulf %29, %25 : vector<64x128xf32>
    %31 = arith.select %27, %25, %30 : vector<64x128xi1>, vector<64x128xf32>
    %c0_16 = arith.constant 0 : index
    %c0_17 = arith.constant 0 : index
    %32 = vector.load %arg6[%c0_16, %c0_17] : memref<128x128xbf16, #tpu.memory_space<vmem>>, vector<128x128xbf16>
    %c0_18 = arith.constant 0 : index
    %c0_19 = arith.constant 0 : index
    %33 = vector.load %arg7[%c0_18, %c0_19] : memref<2x128xf32, #tpu.memory_space<vmem>>, vector<2x128xf32>
    %34 = arith.truncf %31 : vector<64x128xf32> to vector<64x128xbf16>
    %cst_20 = arith.constant dense<0.000000e+00> : vector<64x128xf32>
    %35 = tpu.matmul %34, %32, %cst_20 {dimension_numbers = #tpu.dot_dimension_numbers<[1], [0], [0], [1], [0, 0, 1, 1], [], []>} : vector<64x128xbf16>, vector<128x128xbf16>, vector<64x128xf32> -> vector<64x128xf32>
    %36 = arith.truncf %35 : vector<64x128xf32> to vector<64x128xbf16>
    %cst_21 = arith.constant dense<0.000000e+00> : vector<64x128xf32>
    %37 = tpu.matmul %0, %36, %cst_21 {dimension_numbers = #tpu.dot_dimension_numbers<[1], [0], [0], [1], [0, 0, 1, 1], [], []>} : vector<64x64xbf16>, vector<64x128xbf16>, vector<64x128xf32> -> vector<64x128xf32>
    %38 = vector.extract_strided_slice %33 {offsets = [0, 0], sizes = [1, 128], strides = [1, 1]} : vector<2x128xf32> to vector<1x128xf32>
    %39 = vector.broadcast %38 : vector<1x128xf32> to vector<64x128xf32>
    %40 = arith.addf %37, %39 : vector<64x128xf32>
    %c0_22 = arith.constant 0 : index
    %c0_23 = arith.constant 0 : index
    %41 = vector.load %arg8[%c0_22, %c0_23] : memref<64x128xf32, #tpu.memory_space<vmem>>, vector<64x128xf32>
    tpu.vector_store %arg8[%c0_22, %c0_23], %40 {strides = array<i32>} : memref<64x128xf32, #tpu.memory_space<vmem>>, vector<64x128xf32>,
    return
  }
}

</mosaic_0001>

<bundles_post_ra>
// kernel: tpu_custom_call.1
= control target key start
LH: loop header
LB: loop body
LE: loop exit
PB: predicated region body
PF: predicated region fallthrough
CT: control target
= control target key end

     0   :  { %13 = vsyncpa [#allocation3], 0  ;;  %s1283_s0 = inlined_call_operand.vmem [shape: bf16[64,64], index: 0, kind: input, shape index: {}]   ;;  %s1284_s1 = inlined_call_operand.vmem [shape: f32[64,32], index: 1, kind: input, shape index: {}]   ;;  %s1285_s2 = inlined_call_operand.hbm [shape: bf16[32,128], index: 2, kind: input, shape index: {}]   ;;  %s1286_s3 = inlined_call_operand.vmem [shape: f32[2,128], index: 3, kind: input, shape index: {}]   ;;  %s1287_s4 = inlined_call_operand.vmem [shape: bf16[128,128], index: 4, kind: input, shape index: {}]   ;;  %s1288_s5 = inlined_call_operand.vmem [shape: f32[2,128], index: 5, kind: input, shape index: {}]   ;;  %s1289_s6 = inlined_call_operand.hbm [shape: bf16[128,128], index: 6, kind: input, shape index: {}]   ;;  %s1290_s7 = inlined_call_operand.vmem [shape: f32[2,128], index: 7, kind: input, shape index: {}]   ;;  %s1291_s8 = inlined_call_operand.hbm [shape: f32[64,128], index: 8, kind: output, shape index: {}]  }
   0x1   :  { %14 = vsyncpa [#allocation6], 0 }
   0x2   :  { %15 = vsyncpa [#allocation4], 0  ;;  %s1077_s27 = smov [#allocation2]   ;;  %s1005_s9 = scalar_lea.hbm %s1285_s2, 256 }
   0x3   :  { %s25_s28 = sshll.u32 %s1077_s27, 4  ;;  %p1006_p0 = scmp.ne.s32.totalorder %s1285_s2, %s1005_s9  ;;  %s26_s28 = int_to_ptr.vmem [resolvable:$true] %s25_s28 }
   0x4   :  { %p1009_p1 = scmp.lt.u32.totalorder %s1005_s9, %s1285_s2 }
   0x6   :  { %p1011_p2 = pnand %p1009_p1, %p1006_p0 }
   0x8   :  { %1014 = shalt.err (!%p1011_p2)
}
   0x9   :  { %s1015_s14 = scalar_lea.vmem %s26_s28, 256  ;;  %p1020_p4 = scmp.lt.s32.totalorder %s26_s28, %s26_s28 }
   0xa   :  { %p1016_p3 = scmp.ne.s32.totalorder %s26_s28, %s1015_s14  ;;  %p1021_p5 = scmp.lt.s32.totalorder %s1015_s14, %s1015_s14 }
   0xc   :  { %p1022_p6 = por %p1021_p5, %p1020_p4 }
   0xe   :  { %p1023_p7 = pnand %p1022_p6, %p1016_p3 }
  0x10   :  { %1026 = shalt.err (!%p1023_p7)
}
  0x11   :  { %s1078_s15 = smov 64   ;;  %s1079_s16 = smov 4  }
  0x12   :  { %31 = dma.hbm_to_vmem [thread:$0]  %s1285_s2, 256, %s26_s28, [#allocation3], %s1078_s15, %s1078_s15, %s1079_s16  }
  0x13   :  { %s1080_s19 = smov [#allocation5]   ;;  %s1027_s23 = scalar_lea.hbm %s1289_s6, 1024 }
  0x14   :  { %s43_s20 = sshll.u32 %s1080_s19, 4  ;;  %p1028_p8 = scmp.ne.s32.totalorder %s1289_s6, %s1027_s23  ;;  %s44_s20 = int_to_ptr.vmem [resolvable:$true] %s43_s20 }
  0x15   :  { %p1031_p9 = scmp.lt.u32.totalorder %s1027_s23, %s1289_s6 }
  0x17   :  { %p1033_p10 = pnand %p1031_p9, %p1028_p8 }
  0x19   :  { %1036 = shalt.err (!%p1033_p10)
}
  0x1a   :  { %s1037_s29 = scalar_lea.vmem %s44_s20, 1024  ;;  %p1042_p12 = scmp.lt.s32.totalorder %s44_s20, %s44_s20 }
  0x1b   :  { %p1038_p11 = scmp.ne.s32.totalorder %s44_s20, %s1037_s29  ;;  %p1043_p13 = scmp.lt.s32.totalorder %s1037_s29, %s1037_s29 }
  0x1d   :  { %p1044_p0 = por %p1043_p13, %p1042_p12 }
  0x1f   :  { %p1045_p1 = pnand %p1044_p0, %p1038_p11 }
  0x21   :  { %1048 = shalt.err (!%p1045_p1)
}
  0x22   :  { %49 = dma.hbm_to_vmem [thread:$0]  %s1289_s6, 1024, %s44_s20, [#allocation6], %s1078_s15, %s1078_s15, %s1079_s16  }
  0x23   :  { %1071 = dma.done.wait [#allocation3], 256  }
  0x24   :  { %1072 = vsyncadd [#allocation3], 4294967040 }
  0x25   :  { %1073 = dma.done.wait [#allocation6], 1024  }
  0x26   :  { %1074 = vsyncadd [#allocation6], 4294966272  ;;  %v983_v0 = vld [vmem:[#allocation2] sm:$0xff]   ;;  %v984_v1 = vld [vmem:[#allocation2 + $0x8] sm:$0xff]   ;;  %vm96_vm0 = vcmask 261120   ;;  %vm202_vm1 = vcmask 523264   ;;  %v178_v38 = vlaneseq }
  0x27   :  { %868 = vmatprep.subr.bf16.mxu0 %v983_v0  ;;  %v67_v2 = vld [vmem:[%s1284_s1] sm:$0xff]  ;;  %v68_v3 = vld [vmem:[%s1284_s1 + $0x8] sm:$0xff]  ;;  %v69_v5 = vld [vmem:[%s1284_s1 + $0x10] sm:$0xff]  ;;  %s1081_s24 = smov [#allocation7]  }
  0x28   :  { %869 = vmatpush3.bf16.msra.mxu0 %v983_v0  ;;  %v80_v4 = vpack.c.bf16 %v68_v3, %v67_v2  ;;  %v70_v6 = vld [vmem:[%s1284_s1 + $0x18] sm:$0xff]  ;;  %v71_v7 = vld [vmem:[%s1284_s1 + $0x20] sm:$0xff]  ;;  %v72_v8 = vld [vmem:[%s1284_s1 + $0x28] sm:$0xff]  ;;  %v1235_v39 = vshrl.u32 %v178_v38, 7  ;;  %s763_s25 = sshll.u32 %s1081_s24, 4  ;;  %s764_s25 = int_to_ptr.vmem [resolvable:$true] %s763_s25 }
  0x29   :  { %870 = vmatprep.subr.bf16.mxu0 %v984_v1  ;;  %v81_v9 = vpack.c.bf16 %v70_v6, %v69_v5  ;;  %v82_v10 = vpack.c.bf16 %v72_v8, %v71_v7  ;;  %v73_v11 = vld [vmem:[%s1284_s1 + $0x30] sm:$0xff]  ;;  %v74_v12 = vld [vmem:[%s1284_s1 + $0x38] sm:$0xff]  ;;  %v1184_v14 = vld [vmem:[%s1283_s0] sm:$0xff]   ;;  %p1054_p3 = scmp.lt.s32.totalorder %s764_s25, %s764_s25 }
  0x2a   :  { %872 = vmatprep.mubr.msk.bf16.mxu0 %vm96_vm0, %v80_v4  ;;  %v83_v13 = vpack.c.bf16 %v74_v12, %v73_v11  ;;  %888 = vmatprep.mubr.msk.bf16.mxu1 %vm202_vm1, %v1184_v14  ;;  %v989_v15 = vld [vmem:[%s1287_s4] sm:$0xff]   ;;  %v990_v16 = vld [vmem:[%s1287_s4 + $0x8] sm:$0xff]   ;;  %v991_v17 = vld [vmem:[%s1287_s4 + $0x10] sm:$0xff]   ;;  %v1238_v40 = vsub.s32 0, %v1235_v39  ;;  %v290_v42 = vsub.s32 1, %v1235_v39 }
  0x2b   :  { %v992_v18 = vld [vmem:[%s1287_s4 + $0x18] sm:$0xff]   ;;  %v993_v19 = vld [vmem:[%s1287_s4 + $0x20] sm:$0xff]   ;;  %v1206_v32 = vld [vmem:[%s1283_s0 + $0x8] sm:$0xff]  }
  0x2c   :  { %871 = vmatpush3.bf16.msra.mxu0 %v984_v1  ;;  %v1211_v33 = vld [vmem:[%s1283_s0 + $0x10] sm:$0xff]   ;;  %v1220_v34 = vld [vmem:[%s1283_s0 + $0x18] sm:$0xff]   ;;  %v994_v35 = vld [vmem:[%s1287_s4 + $0x28] sm:$0xff]  }
  0x2d   :  { %896 = vmatprep.subr.bf16.mxu0 %v989_v15  ;;  %v995_v36 = vld [vmem:[%s1287_s4 + $0x30] sm:$0xff]   ;;  %v996_v37 = vld [vmem:[%s1287_s4 + $0x38] sm:$0xff]   ;;  %v79_v41 = vld [vmem:[%s1286_s3] sm:$0x3] }
  0x2e   :  { %v181_v43 = vrot.slane %v79_v41, %v1238_v40  ;;  %v291_v44 = vrot.slane %v79_v41, %v290_v42  ;;  %v1003_v38 = vld [vmem:[#allocation5 + $0x30] sm:$0xff]   ;;  %v1004_v41 = vld [vmem:[#allocation5 + $0x38] sm:$0xff]  }
  0x2f   :  { %873 = vmatmul.mubr.msk.bf16.vlgmr.msra.gmra.mrb[0].mxu0 %vm96_vm0, %v81_v9 }
  0x30   :  { %876 = vmatprep.mubr.msk.bf16.mxu0 %vm96_vm0, %v82_v10  ;;  %897 = vmatpush3.bf16.msra.mxu0 %v989_v15 }
  0x31   :  { %898 = vmatprep.subr.bf16.mxu0 %v990_v16 }
  0x34   :  { %899 = vmatpush3.bf16.msra.mxu0 %v990_v16 }
  0x35   :  { %900 = vmatprep.subr.bf16.mxu0 %v991_v17 }
  0x37   :  { %877 = vmatmul.mubr.msk.bf16.gmra.mrb[4].mxu0 %vm96_vm0, %v83_v13 }
  0x38   :  { %901 = vmatpush3.bf16.msra.mxu0 %v991_v17 }
  0x39   :  { %902 = vmatprep.subr.bf16.mxu0 %v992_v18 }
  0x3c   :  { %903 = vmatpush3.bf16.msra.mxu0 %v992_v18 }
  0x3d   :  { %904 = vmatprep.subr.bf16.mxu0 %v993_v19 }
  0x40   :  { %905 = vmatpush3.bf16.msra.mxu0 %v993_v19 }
  0x41   :  { %906 = vmatprep.subr.bf16.mxu0 %v994_v35 }
  0x44   :  { %907 = vmatpush3.bf16.msra.mxu0 %v994_v35  ;;  %v1000_v35 = vld [vmem:[#allocation5 + $0x18] sm:$0xff]  }
  0x45   :  { %908 = vmatprep.subr.bf16.mxu0 %v995_v36 }
  0x48   :  { %909 = vmatpush3.bf16.msra.mxu0 %v995_v36  ;;  %v1001_v36 = vld [vmem:[#allocation5 + $0x20] sm:$0xff]  }
  0x49   :  { %910 = vmatprep.subr.bf16.mxu0 %v996_v37 }
  0x4c   :  { %911 = vmatpush3.bf16.msra.mxu0 %v996_v37  ;;  %v1002_v37 = vld [vmem:[#allocation5 + $0x28] sm:$0xff]  }
 0x102   :  { %v874_v20 = vpop.f32.mrb[0].mxu0 }
 0x103   :  { %v143_v21 = vpop.f32.mrb[1].mxu0 }
 0x104   :  { %v875_v22 = vpop.f32.mrb[2].mxu0 }
 0x105   :  { %v175_v23 = vpack.c.bf16 %v875_v22, %v874_v20  ;;  %v146_v24 = vpop.f32.mrb[3].mxu0 }
 0x106   :  { %v174_v25 = vpack.c.bf16 %v146_v24, %v143_v21 }
 0x108   :  { %880 = vmatprep.subr.bf16.mxu1 %v174_v25 }
 0x109   :  { %881 = vmatpush3.bf16.msra.mxu1 %v174_v25 }
 0x10a   :  { %v878_v26 = vpop.f32.mrb[4].mxu0  ;;  %882 = vmatprep.subr.bf16.mxu1 %v175_v23 }
 0x10b   :  { %v159_v27 = vpop.f32.mrb[5].mxu0 }
 0x10c   :  { %v879_v28 = vpop.f32.mrb[6].mxu0 }
 0x10d   :  { %v177_v29 = vpack.c.bf16 %v879_v28, %v878_v26  ;;  %v162_v30 = vpop.f32.mrb[7].mxu0  ;;  %883 = vmatpush3.bf16.msra.mxu1 %v175_v23 }
 0x10e   :  { %v176_v31 = vpack.c.bf16 %v162_v30, %v159_v27  ;;  %v998_v30 = vld [vmem:[#allocation5 + $0x8] sm:$0xff]  }
 0x110   :  { %884 = vmatprep.subr.bf16.mxu1 %v176_v31 }
 0x111   :  { %885 = vmatpush3.bf16.msra.mxu1 %v176_v31  ;;  %v999_v31 = vld [vmem:[#allocation5 + $0x10] sm:$0xff]  }
 0x112   :  { %886 = vmatprep.subr.bf16.mxu1 %v177_v29 }
 0x115   :  { %887 = vmatpush3.bf16.msra.mxu1 %v177_v29 }
 0x118   :  { %889 = vmatmul.mubr.msk.bf16.vlgmr.msra.gmra.mrb[0].mxu1 %vm202_vm1, %v1206_v32 }
 0x119   :  { %892 = vmatprep.mubr.msk.bf16.mxu1 %vm202_vm1, %v1211_v33 }
 0x120   :  { %893 = vmatmul.mubr.msk.bf16.gmra.mrb[4].mxu1 %vm202_vm1, %v1220_v34 }
 0x121   :  { %928 = vmatprep.mubr.msk.bf16.mxu1 %vm202_vm1, %v1184_v14 }
 0x1eb   :  { %v890_v45 = vpop.f32.mrb[0].mxu1 }
 0x1ec   :  { %v258_v46 = vadd.f32 %v890_v45, %v181_v43  ;;  %v249_v47 = vpop.f32.mrb[1].mxu1 }
 0x1ed   :  { %v250_v48 = vadd.f32 %v249_v47, %v181_v43  ;;  %v891_v49 = vpop.f32.mrb[2].mxu1 }
 0x1ee   :  { %v294_v50 = vmul.f32 %v291_v44, %v258_v46  ;;  %v261_v51 = vadd.f32 %v891_v49, %v181_v43  ;;  %v252_v52 = vpop.f32.mrb[3].mxu1  ;;  %vm282_vm2 = vcmp.gt.f32.partialorder %v258_v46, 0.0 }
 0x1ef   :  { %v292_v53 = vmul.f32 %v291_v44, %v250_v48  ;;  %v253_v54 = vadd.f32 %v252_v52, %v181_v43  ;;  %vm280_vm3 = vcmp.gt.f32.partialorder %v250_v48, 0.0 }
 0x1f0   :  { %vm283_vm4 = vcmp.gt.f32.partialorder %v261_v51, 0.0  ;;  %v295_v55 = vmul.f32 %v291_v44, %v261_v51  ;;  %v302_v57 = vsel %vm282_vm2, %v258_v46, %v294_v50 }
 0x1f1   :  { %vm281_vm5 = vcmp.gt.f32.partialorder %v253_v54, 0.0  ;;  %v293_v56 = vmul.f32 %v291_v44, %v253_v54  ;;  %v300_v61 = vsel %vm280_vm3, %v250_v48, %v292_v53 }
 0x1f2   :  { %v303_v58 = vsel %vm283_vm4, %v261_v51, %v295_v55 }
 0x1f3   :  { %v326_v59 = vpack.c.bf16 %v303_v58, %v302_v57  ;;  %v894_v60 = vpop.f32.mrb[4].mxu1  ;;  %v301_v62 = vsel %vm281_vm5, %v253_v54, %v293_v56 }
 0x1f4   :  { %v274_v63 = vadd.f32 %v894_v60, %v181_v43  ;;  %v265_v0 = vpop.f32.mrb[5].mxu1  ;;  %v325_v1 = vpack.c.bf16 %v301_v62, %v300_v61 }
 0x1f5   :  { %v266_v2 = vadd.f32 %v265_v0, %v181_v43  ;;  %v895_v3 = vpop.f32.mrb[6].mxu1 }
 0x1f6   :  { %v298_v4 = vmul.f32 %v291_v44, %v274_v63  ;;  %v277_v5 = vadd.f32 %v895_v3, %v181_v43  ;;  %v268_v6 = vpop.f32.mrb[7].mxu1  ;;  %912 = vmatprep.mubr.bf16.mxu0 %v325_v1  ;;  %vm286_vm6 = vcmp.gt.f32.partialorder %v274_v63, 0.0 }
 0x1f7   :  { %v296_v7 = vmul.f32 %v291_v44, %v266_v2  ;;  %v269_v8 = vadd.f32 %v268_v6, %v181_v43  ;;  %913 = vmatmul.mubr.bf16.vlgmr.msra.gmra.mrb[8].mxu0 %v326_v59  ;;  %vm284_vm7 = vcmp.gt.f32.partialorder %v266_v2, 0.0  ;;  %v324_v43 = vld [vmem:[%s1288_s5] sm:$0x3] }
 0x1f8   :  { %vm287_vm8 = vcmp.gt.f32.partialorder %v277_v5, 0.0  ;;  %v299_v9 = vmul.f32 %v291_v44, %v277_v5  ;;  %v306_v11 = vsel %vm286_vm6, %v274_v63, %v298_v4  ;;  %v526_v45 = vrot.slane %v324_v43, %v290_v42 }
 0x1f9   :  { %vm285_vm9 = vcmp.gt.f32.partialorder %v269_v8, 0.0  ;;  %v297_v10 = vmul.f32 %v291_v44, %v269_v8  ;;  %v304_v13 = vsel %vm284_vm7, %v266_v2, %v296_v7  ;;  %v449_v44 = vrot.slane %v324_v43, %v1238_v40 }
 0x1fa   :  { %v307_v12 = vsel %vm287_vm8, %v277_v5, %v299_v9 }
 0x1fb   :  { %v305_v15 = vsel %vm285_vm9, %v269_v8, %v297_v10  ;;  %v328_v16 = vpack.c.bf16 %v307_v12, %v306_v11 }
 0x1fc   :  { %v327_v17 = vpack.c.bf16 %v305_v15, %v304_v13 }
 0x1fe   :  { %916 = vmatprep.mubr.bf16.mxu0 %v327_v17 }
 0x1ff   :  { %917 = vmatmul.mubr.bf16.gmra.mrb[12].mxu0 %v328_v16 }
 0x200   :  { %968 = vmatprep.mubr.msk.bf16.mxu0 %vm202_vm1, %v1184_v14  ;;  %v997_v14 = vld [vmem:[#allocation5] sm:$0xff]  }
 0x2ca   :  { %v914_v18 = vpop.f32.mrb[8].mxu0 }
 0x2cb   :  { %v411_v19 = vpop.f32.mrb[9].mxu0 }
 0x2cc   :  { %v915_v20 = vpop.f32.mrb[10].mxu0 }
 0x2cd   :  { %v443_v21 = vpack.c.bf16 %v915_v20, %v914_v18  ;;  %v414_v22 = vpop.f32.mrb[11].mxu0 }
 0x2ce   :  { %v442_v23 = vpack.c.bf16 %v414_v22, %v411_v19 }
 0x2d0   :  { %920 = vmatprep.subr.bf16.mxu1 %v442_v23 }
 0x2d1   :  { %921 = vmatpush3.bf16.msra.mxu1 %v442_v23 }
 0x2d2   :  { %v918_v24 = vpop.f32.mrb[12].mxu0  ;;  %922 = vmatprep.subr.bf16.mxu1 %v443_v21 }
 0x2d3   :  { %v427_v25 = vpop.f32.mrb[13].mxu0 }
 0x2d4   :  { %v919_v26 = vpop.f32.mrb[14].mxu0 }
 0x2d5   :  { %v445_v27 = vpack.c.bf16 %v919_v26, %v918_v24  ;;  %v430_v28 = vpop.f32.mrb[15].mxu0  ;;  %923 = vmatpush3.bf16.msra.mxu1 %v443_v21 }
 0x2d6   :  { %v444_v29 = vpack.c.bf16 %v430_v28, %v427_v25 }
 0x2d8   :  { %924 = vmatprep.subr.bf16.mxu1 %v444_v29 }
 0x2d9   :  { %925 = vmatpush3.bf16.msra.mxu1 %v444_v29  ;;  %v559_v29 = vld [vmem:[%s1290_s7] sm:$0x3]  ;;  %s1049_s7 = scalar_lea.vmem %s764_s25, 1024 }
 0x2da   :  { %926 = vmatprep.subr.bf16.mxu1 %v445_v27  ;;  %p1050_p2 = scmp.ne.s32.totalorder %s764_s25, %s1049_s7  ;;  %p1055_p4 = scmp.lt.s32.totalorder %s1049_s7, %s1049_s7 }
 0x2dc   :  { %p1056_p5 = por %p1055_p4, %p1054_p3 }
 0x2dd   :  { %927 = vmatpush3.bf16.msra.mxu1 %v445_v27 }
 0x2de   :  { %936 = vmatprep.subr.bf16.mxu1 %v997_v14  ;;  %p1057_p6 = pnand %p1056_p5, %p1050_p2 }
 0x2e0   :  { %929 = vmatmul.mubr.msk.bf16.vlgmr.msra.gmra.mrb[8].mxu1 %vm202_vm1, %v1206_v32 }
 0x2e1   :  { %932 = vmatprep.mubr.msk.bf16.mxu1 %vm202_vm1, %v1211_v33  ;;  %937 = vmatpush3.bf16.msra.mxu1 %v997_v14  ;;  %v684_v14 = vrot.slane %v559_v29, %v1238_v40 }
 0x2e2   :  { %938 = vmatprep.subr.bf16.mxu1 %v998_v30 }
 0x2e5   :  { %939 = vmatpush3.bf16.msra.mxu1 %v998_v30 }
 0x2e6   :  { %940 = vmatprep.subr.bf16.mxu1 %v999_v31 }
 0x2e8   :  { %933 = vmatmul.mubr.msk.bf16.gmra.mrb[12].mxu1 %vm202_vm1, %v1220_v34 }
 0x2e9   :  { %941 = vmatpush3.bf16.msra.mxu1 %v999_v31 }
 0x2ea   :  { %942 = vmatprep.subr.bf16.mxu1 %v1000_v35 }
 0x2ed   :  { %943 = vmatpush3.bf16.msra.mxu1 %v1000_v35 }
 0x2ee   :  { %944 = vmatprep.subr.bf16.mxu1 %v1001_v36 }
 0x2f1   :  { %945 = vmatpush3.bf16.msra.mxu1 %v1001_v36 }
 0x2f2   :  { %946 = vmatprep.subr.bf16.mxu1 %v1002_v37 }
 0x2f5   :  { %947 = vmatpush3.bf16.msra.mxu1 %v1002_v37 }
 0x2f6   :  { %948 = vmatprep.subr.bf16.mxu1 %v1003_v38 }
 0x2f9   :  { %949 = vmatpush3.bf16.msra.mxu1 %v1003_v38 }
 0x2fa   :  { %950 = vmatprep.subr.bf16.mxu1 %v1004_v41 }
 0x2fd   :  { %951 = vmatpush3.bf16.msra.mxu1 %v1004_v41 }
 0x3b3   :  { %v930_v46 = vpop.f32.mrb[8].mxu1 }
 0x3b4   :  { %v493_v47 = vadd.f32 %v930_v46, %v449_v44  ;;  %v484_v48 = vpop.f32.mrb[9].mxu1 }
 0x3b5   :  { %v485_v49 = vadd.f32 %v484_v48, %v449_v44  ;;  %v931_v50 = vpop.f32.mrb[10].mxu1 }
 0x3b6   :  { %v529_v51 = vmul.f32 %v526_v45, %v493_v47  ;;  %v496_v52 = vadd.f32 %v931_v50, %v449_v44  ;;  %v487_v53 = vpop.f32.mrb[11].mxu1  ;;  %vm517_vm10 = vcmp.gt.f32.partialorder %v493_v47, 0.0 }
 0x3b7   :  { %v527_v54 = vmul.f32 %v526_v45, %v485_v49  ;;  %v488_v55 = vadd.f32 %v487_v53, %v449_v44  ;;  %vm515_vm11 = vcmp.gt.f32.partialorder %v485_v49, 0.0 }
 0x3b8   :  { %vm518_vm12 = vcmp.gt.f32.partialorder %v496_v52, 0.0  ;;  %v530_v56 = vmul.f32 %v526_v45, %v496_v52  ;;  %v537_v58 = vsel %vm517_vm10, %v493_v47, %v529_v51 }
 0x3b9   :  { %vm516_vm13 = vcmp.gt.f32.partialorder %v488_v55, 0.0  ;;  %v528_v57 = vmul.f32 %v526_v45, %v488_v55  ;;  %v535_v60 = vsel %vm515_vm11, %v485_v49, %v527_v54 }
 0x3ba   :  { %v538_v59 = vsel %vm518_vm12, %v496_v52, %v530_v56 }
 0x3bb   :  { %v561_v39 = vpack.c.bf16 %v538_v59, %v537_v58  ;;  %v934_v42 = vpop.f32.mrb[12].mxu1  ;;  %v536_v61 = vsel %vm516_vm13, %v488_v55, %v528_v57 }
 0x3bc   :  { %v509_v62 = vadd.f32 %v934_v42, %v449_v44  ;;  %v500_v63 = vpop.f32.mrb[13].mxu1  ;;  %v560_v0 = vpack.c.bf16 %v536_v61, %v535_v60 }
 0x3bd   :  { %v501_v1 = vadd.f32 %v500_v63, %v449_v44  ;;  %v935_v2 = vpop.f32.mrb[14].mxu1 }
 0x3be   :  { %v533_v3 = vmul.f32 %v526_v45, %v509_v62  ;;  %v512_v4 = vadd.f32 %v935_v2, %v449_v44  ;;  %v503_v5 = vpop.f32.mrb[15].mxu1  ;;  %952 = vmatprep.mubr.bf16.mxu1 %v560_v0  ;;  %vm521_vm14 = vcmp.gt.f32.partialorder %v509_v62, 0.0 }
 0x3bf   :  { %v531_v6 = vmul.f32 %v526_v45, %v501_v1  ;;  %v504_v7 = vadd.f32 %v503_v5, %v449_v44  ;;  %953 = vmatmul.mubr.bf16.vlgmr.msra.gmra.mrb[16].mxu1 %v561_v39  ;;  %vm519_vm15 = vcmp.gt.f32.partialorder %v501_v1, 0.0 }
 0x3c0   :  { %vm522_vm0 = vcmp.gt.f32.partialorder %v512_v4, 0.0  ;;  %v534_v8 = vmul.f32 %v526_v45, %v512_v4  ;;  %v541_v10 = vsel %vm521_vm14, %v509_v62, %v533_v3 }
 0x3c1   :  { %vm520_vm2 = vcmp.gt.f32.partialorder %v504_v7, 0.0  ;;  %v532_v9 = vmul.f32 %v526_v45, %v504_v7  ;;  %v539_v12 = vsel %vm519_vm15, %v501_v1, %v531_v6 }
 0x3c2   :  { %v542_v11 = vsel %vm522_vm0, %v512_v4, %v534_v8 }
 0x3c3   :  { %v540_v13 = vsel %vm520_vm2, %v504_v7, %v532_v9  ;;  %v563_v15 = vpack.c.bf16 %v542_v11, %v541_v10 }
 0x3c4   :  { %v562_v16 = vpack.c.bf16 %v540_v13, %v539_v12 }
 0x3c6   :  { %956 = vmatprep.mubr.bf16.mxu1 %v562_v16 }
 0x3c7   :  { %957 = vmatmul.mubr.bf16.gmra.mrb[20].mxu1 %v563_v15 }
 0x492   :  { %v954_v17 = vpop.f32.mrb[16].mxu1 }
 0x493   :  { %v646_v18 = vpop.f32.mrb[17].mxu1 }
 0x494   :  { %v955_v19 = vpop.f32.mrb[18].mxu1 }
 0x495   :  { %v678_v20 = vpack.c.bf16 %v955_v19, %v954_v17  ;;  %v649_v21 = vpop.f32.mrb[19].mxu1 }
 0x496   :  { %v677_v22 = vpack.c.bf16 %v649_v21, %v646_v18 }
 0x498   :  { %960 = vmatprep.subr.bf16.mxu0 %v677_v22 }
 0x499   :  { %961 = vmatpush3.bf16.msra.mxu0 %v677_v22 }
 0x49a   :  { %v958_v23 = vpop.f32.mrb[20].mxu1  ;;  %962 = vmatprep.subr.bf16.mxu0 %v678_v20 }
 0x49b   :  { %v662_v24 = vpop.f32.mrb[21].mxu1 }
 0x49c   :  { %v959_v25 = vpop.f32.mrb[22].mxu1 }
 0x49d   :  { %v680_v26 = vpack.c.bf16 %v959_v25, %v958_v23  ;;  %v665_v27 = vpop.f32.mrb[23].mxu1  ;;  %963 = vmatpush3.bf16.msra.mxu0 %v678_v20 }
 0x49e   :  { %v679_v28 = vpack.c.bf16 %v665_v27, %v662_v24 }
 0x4a0   :  { %964 = vmatprep.subr.bf16.mxu0 %v679_v28 }
 0x4a1   :  { %965 = vmatpush3.bf16.msra.mxu0 %v679_v28 }
 0x4a2   :  { %966 = vmatprep.subr.bf16.mxu0 %v680_v26 }
 0x4a5   :  { %967 = vmatpush3.bf16.msra.mxu0 %v680_v26 }
 0x4a8   :  { %969 = vmatmul.mubr.msk.bf16.vlgmr.msra.gmra.mrb[16].mxu0 %vm202_vm1, %v1206_v32 }
 0x4a9   :  { %972 = vmatprep.mubr.msk.bf16.mxu0 %vm202_vm1, %v1211_v33 }
 0x4b0   :  { %973 = vmatmul.mubr.msk.bf16.gmra.mrb[20].mxu0 %vm202_vm1, %v1220_v34 }
 0x57b   :  { %v970_v30 = vpop.f32.mrb[16].mxu0 }
 0x57c   :  { %v728_v31 = vadd.f32 %v970_v30, %v684_v14  ;;  %v719_v35 = vpop.f32.mrb[17].mxu0 }
 0x57d   :  { %v720_v36 = vadd.f32 %v719_v35, %v684_v14  ;;  %v971_v37 = vpop.f32.mrb[18].mxu0 }
 0x57e   :  { %752 = vst [vmem:[#allocation7 + $0x10] sm:$0xff] %v728_v31  ;;  %v731_v38 = vadd.f32 %v971_v37, %v684_v14  ;;  %v722_v32 = vpop.f32.mrb[19].mxu0 }
 0x57f   :  { %750 = vst [vmem:[#allocation7] sm:$0xff] %v720_v36  ;;  %v723_v41 = vadd.f32 %v722_v32, %v684_v14 }
 0x580   :  { %753 = vst [vmem:[#allocation7 + $0x18] sm:$0xff] %v731_v38 }
 0x581   :  { %751 = vst [vmem:[#allocation7 + $0x8] sm:$0xff] %v723_v41 }
 0x583   :  { %v974_v33 = vpop.f32.mrb[20].mxu0 }
 0x584   :  { %v744_v34 = vadd.f32 %v974_v33, %v684_v14  ;;  %v735_v43 = vpop.f32.mrb[21].mxu0 }
 0x585   :  { %v736_v44 = vadd.f32 %v735_v43, %v684_v14  ;;  %v975_v45 = vpop.f32.mrb[22].mxu0 }
 0x586   :  { %756 = vst [vmem:[#allocation7 + $0x30] sm:$0xff] %v744_v34  ;;  %v747_v40 = vadd.f32 %v975_v45, %v684_v14  ;;  %v738_v46 = vpop.f32.mrb[23].mxu0 }
 0x587   :  { %754 = vst [vmem:[#allocation7 + $0x20] sm:$0xff] %v736_v44  ;;  %v739_v47 = vadd.f32 %v738_v46, %v684_v14 }
 0x588   :  { %757 = vst [vmem:[#allocation7 + $0x38] sm:$0xff] %v747_v40 }
 0x589   :  { %755 = vst [vmem:[#allocation7 + $0x28] sm:$0xff] %v739_v47 }
 0x58a   :  { %1060 = shalt.err (!%p1057_p6)
}
 0x58b   :  { %s1061_s27 = scalar_lea.hbm %s1291_s8, 1024 }
 0x58c   :  { %p1062_p7 = scmp.ne.s32.totalorder %s1291_s8, %s1061_s27  ;;  %p1065_p8 = scmp.lt.u32.totalorder %s1061_s27, %s1291_s8 }
 0x58e   :  { %p1067_p9 = pnand %p1065_p8, %p1062_p7 }
 0x590   :  { %1070 = shalt.err (!%p1067_p9)
}
 0x591   :  { %s1082_s9 = smov 128   ;;  %s1083_s10 = smov 8  }
 0x592   :  { %769 = dma.vmem_to_hbm [thread:$0]  %s764_s25, 1024, %s1291_s8, [#allocation4], %s1082_s9, %s1082_s9, %s1083_s10  }
 0x593   :  { %1075 = dma.done.wait [#allocation4], 1024  }
 0x594   :  { %1076 = vsyncadd [#allocation4], 4294966272 }
 0x595   :  { %773 = vsyncpa [#allocation3], 1 }
 0x596   :  { %774 = vsyncpa [#allocation6], 1 }
 0x597   :  { %775 = vsyncpa [#allocation4], 1 }

</bundles_post_ra>
